<compile_context>
chip_gen: v5e
topology: v5e:2x2
jax: 0.10.0
libtpu: 0.0.40
codegen_flags: <defaults>
</compile_context>

<pallas_src>
import functools

import jax
import jax.numpy as jnp
from jax import lax
from jax.experimental import pallas as pl
from jax.experimental.pallas import tpu as pltpu


def _round_up(x: int, m: int) -> int:
    return ((x + m - 1) // m) * m


def _linear_act_kernel(x_ref, w_ref, b_ref, o_ref, acc_ref, *,
                       apply_relu: bool, compute_dtype):
    # x_ref : (tm, tk)   input tile
    # w_ref : (tn, tk)   weight tile, torch layout (out, in) — no transpose needed
    # b_ref : (1,  tn)   bias tile
    # o_ref : (tm, tn)   output tile
    # acc_ref: (tm, tn)  f32 accumulator (scratch, persists across k)
    k = pl.program_id(2)

    @pl.when(k == 0)
    def _():
        acc_ref[...] = jnp.zeros_like(acc_ref)

    x = x_ref[...]
    w = w_ref[...]
    if compute_dtype is not None:
        x = x.astype(compute_dtype)
        w = w.astype(compute_dtype)

    # Contract last dim of x with last dim of w: (tm, tk) x (tn, tk) -> (tm, tn).
    acc_ref[...] += lax.dot_general(
        x, w,
        dimension_numbers=(((1,), (1,)), ((), ())),
        preferred_element_type=jnp.float32,
    )

    @pl.when(k == pl.num_programs(2) - 1)
    def _():
        acc = acc_ref[...] + b_ref[...].astype(jnp.float32)
        if apply_relu:
            acc = jnp.maximum(acc, 0.0)
        o_ref[...] = acc.astype(o_ref.dtype)


def layer_forward(x, weight, bias, *, activation=True,
                  tile_m=None, tile_n=None, tile_k=None, compute_dtype=None):
    """y = activation(x @ weight.T + bias); activation=True -> ReLU, False -> identity.

    x:      (B, in_features)
    weight: (out_features, in_features)   (torch.nn.Linear convention, not transposed)
    bias:   (out_features,)
    """
    # TODO(synk): HP.activation may also be an arbitrary Callable; only True (ReLU)
    # and False (identity) are lowered into the kernel here.
    B, K = x.shape
    N, K2 = weight.shape
    assert K == K2, "in_features mismatch"
    assert bias.shape == (N,)

    # Tile sizes: lane-dense output (tn multiple of 128), rows multiple of 8,
    # K multiple of 128.  Small enough to fit v7x (64 MiB VMEM) with room to spare.
    if tile_m is None:
        tile_m = min(256, _round_up(B, 8))
    if tile_n is None:
        tile_n = min(256, _round_up(N, 128))
    if tile_k is None:
        tile_k = min(512, _round_up(K, 128))

    Mp = _round_up(B, tile_m)
    Np = _round_up(N, tile_n)
    Kp = _round_up(K, tile_k)

    xp = x if (Mp == B and Kp == K) else jnp.pad(x, ((0, Mp - B), (0, Kp - K)))
    wp = weight if (Np == N and Kp == K) else jnp.pad(weight, ((0, Np - N), (0, Kp - K)))
    bp = (bias if Np == N else jnp.pad(bias, (0, Np - N))).reshape(1, Np)

    grid = (Mp // tile_m, Np // tile_n, Kp // tile_k)

    kernel = functools.partial(
        _linear_act_kernel, apply_relu=bool(activation), compute_dtype=compute_dtype)

    # Explicit VMEM budget: double-buffered x/w/bias/out tiles + f32 accumulator,
    # with 2x headroom, clamped well below the v7x 64 MiB physical limit.
    itemsize = jnp.dtype(x.dtype).itemsize
    vmem_needed = (
        2 * (tile_m * tile_k + tile_n * tile_k + tile_n) * itemsize  # inputs, dbl-buf
        + 2 * tile_m * tile_n * itemsize                             # output, dbl-buf
        + tile_m * tile_n * 4                                        # f32 accumulator
    )
    vmem_limit = int(min(max(2 * vmem_needed, 4 << 20), 48 << 20))

    out = pl.pallas_call(
        kernel,
        out_shape=jax.ShapeDtypeStruct((Mp, Np), x.dtype),
        grid_spec=pltpu.PrefetchScalarGridSpec(
            num_scalar_prefetch=0,
            grid=grid,
            in_specs=[
                pl.BlockSpec((tile_m, tile_k), lambda i, j, k: (i, k)),  # x tile
                pl.BlockSpec((tile_n, tile_k), lambda i, j, k: (j, k)),  # W tile (N,K)
                pl.BlockSpec((1, tile_n), lambda i, j, k: (0, j)),       # bias tile
            ],
            out_specs=pl.BlockSpec((tile_m, tile_n), lambda i, j, k: (i, j)),
            scratch_shapes=[pltpu.VMEM((tile_m, tile_n), jnp.float32)],
        ),
        compiler_params=pltpu.CompilerParams(
            dimension_semantics=("parallel", "parallel", "arbitrary"),
            vmem_limit_bytes=vmem_limit,
        ),
    )(xp, wp, bp)

    if Mp != B or Np != N:
        out = out[:B, :N]
    return out


if __name__ == "__main__":
    # Small shapes consistent with the module: Linear(in_features -> out_features).
    batch = 8
    in_features = 32
    out_features = 64

    key = jax.random.PRNGKey(0)
    kx, kw, kb = jax.random.split(key, 3)

    x = jax.random.normal(kx, (batch, in_features), dtype=jnp.float32)
    # torch.nn.Linear-style uniform(-1/sqrt(in), 1/sqrt(in)) init.
    bound = 1.0 / (in_features ** 0.5)
    weight = jax.random.uniform(
        kw, (out_features, in_features), minval=-bound, maxval=bound, dtype=jnp.float32
    )
    bias = jax.random.uniform(
        kb, (out_features,), minval=-bound, maxval=bound, dtype=jnp.float32
    )

    y = layer_forward(x, weight, bias, activation=True)  # HP.activation=True -> ReLU
    y = jax.block_until_ready(y)

    # Pure-JAX reference check.
    y_ref = jnp.maximum(x @ weight.T + bias, 0.0)
    assert y.shape == (batch, out_features)
    assert jnp.allclose(y, y_ref, atol=1e-5, rtol=1e-5), "mismatch vs reference"

    # Also check the identity-activation path and a ragged/larger shape.
    y2 = jax.block_until_ready(layer_forward(x, weight, bias, activation=False))
    assert jnp.allclose(y2, x @ weight.T + bias, atol=1e-5, rtol=1e-5)

    B2, K2_, N2 = 37, 200, 300   # ragged sizes exercise the pad/slice path
    x2 = jax.random.normal(kx, (B2, K2_), dtype=jnp.float32)
    w2 = jax.random.normal(kw, (N2, K2_), dtype=jnp.float32) * 0.05
    b2 = jax.random.normal(kb, (N2,), dtype=jnp.float32) * 0.05
    y3 = jax.block_until_ready(layer_forward(x2, w2, b2, activation=True))
    y3_ref = jnp.maximum(x2 @ w2.T + b2, 0.0)
    assert jnp.allclose(y3, y3_ref, atol=1e-4, rtol=1e-4), "ragged mismatch"

    print("KERNEL_OK")
</pallas_src>

<mosaic_0001>
module attributes {stable_mosaic.version = 11 : i64} {
  func.func @_linear_act_kernel(%arg0: i32, %arg1: i32, %arg2: i32, %arg3: memref<8x128xf32, #tpu.memory_space<vmem>>, %arg4: memref<128x128xf32, #tpu.memory_space<vmem>>, %arg5: memref<1x128xf32, #tpu.memory_space<vmem>>, %arg6: memref<8x128xf32, #tpu.memory_space<vmem>>, %arg7: memref<8x128xf32, #tpu.memory_space<vmem>>) attributes {dimension_semantics = [#tpu.dimension_semantics<parallel>, #tpu.dimension_semantics<parallel>, #tpu.dimension_semantics<arbitrary>], iteration_bounds = array<i64: 1, 1, 1>, scalar_prefetch = 0 : i64, scratch_operands = 1 : i64, tpu.core_type = #tpu.core_type<tc>, window_params = [{transform_indices = @transform_0, window_bounds = array<i64: 8, 128>}, {transform_indices = @transform_1, window_bounds = array<i64: 128, 128>}, {transform_indices = @transform_2, window_bounds = array<i64: 1, 128>}, {transform_indices = @transform_3, window_bounds = array<i64: 8, 128>}]} {
    %c0_i32 = arith.constant 0 : i32
    %0 = arith.cmpi eq, %arg2, %c0_i32 : i32
    %1 = arith.extui %0 : i1 to i32
    %c0_i32_0 = arith.constant 0 : i32
    %2 = arith.cmpi ne, %1, %c0_i32_0 : i32
    scf.if %2 {
      %cst_10 = arith.constant 0.000000e+00 : f32
      %12 = vector.broadcast %cst_10 : f32 to vector<8x128xf32>
      %c0_11 = arith.constant 0 : index
      %c0_12 = arith.constant 0 : index
      %13 = vector.load %arg7[%c0_11, %c0_12] : memref<8x128xf32, #tpu.memory_space<vmem>>, vector<8x128xf32>
      tpu.vector_store %arg7[%c0_11, %c0_12], %12 {strides = array<i32>} : memref<8x128xf32, #tpu.memory_space<vmem>>, vector<8x128xf32>,
    } else {
    }
    %c0 = arith.constant 0 : index
    %c0_1 = arith.constant 0 : index
    %3 = vector.load %arg3[%c0, %c0_1] : memref<8x128xf32, #tpu.memory_space<vmem>>, vector<8x128xf32>
    %c0_2 = arith.constant 0 : index
    %c0_3 = arith.constant 0 : index
    %4 = vector.load %arg4[%c0_2, %c0_3] : memref<128x128xf32, #tpu.memory_space<vmem>>, vector<128x128xf32>
    %c0_4 = arith.constant 0 : index
    %c0_5 = arith.constant 0 : index
    %5 = vector.load %arg7[%c0_4, %c0_5] : memref<8x128xf32, #tpu.memory_space<vmem>>, vector<8x128xf32>
    %cst = arith.constant dense<0.000000e+00> : vector<8x128xf32>
    %6 = tpu.matmul %3, %4, %cst {dimension_numbers = #tpu.dot_dimension_numbers<[1], [1], [0], [0], [0, 0, 1, 0], [], []>} : vector<8x128xf32>, vector<128x128xf32>, vector<8x128xf32> -> vector<8x128xf32>
    %7 = arith.addf %5, %6 : vector<8x128xf32>
    %c0_6 = arith.constant 0 : index
    %c0_7 = arith.constant 0 : index
    %8 = vector.load %arg7[%c0_6, %c0_7] : memref<8x128xf32, #tpu.memory_space<vmem>>, vector<8x128xf32>
    tpu.vector_store %arg7[%c0_6, %c0_7], %7 {strides = array<i32>} : memref<8x128xf32, #tpu.memory_space<vmem>>, vector<8x128xf32>,
    %c0_i32_8 = arith.constant 0 : i32
    %9 = arith.cmpi eq, %arg2, %c0_i32_8 : i32
    %10 = arith.extui %9 : i1 to i32
    %c0_i32_9 = arith.constant 0 : i32
    %11 = arith.cmpi ne, %10, %c0_i32_9 : i32
    scf.if %11 {
      %c0_10 = arith.constant 0 : index
      %c0_11 = arith.constant 0 : index
      %12 = vector.load %arg7[%c0_10, %c0_11] : memref<8x128xf32, #tpu.memory_space<vmem>>, vector<8x128xf32>
      %c0_12 = arith.constant 0 : index
      %c0_13 = arith.constant 0 : index
      %13 = vector.load %arg5[%c0_12, %c0_13] : memref<1x128xf32, #tpu.memory_space<vmem>>, vector<1x128xf32>
      %14 = vector.broadcast %13 : vector<1x128xf32> to vector<8x128xf32>
      %15 = arith.addf %12, %14 : vector<8x128xf32>
      %cst_14 = arith.constant 0.000000e+00 : f32
      %16 = vector.broadcast %cst_14 : f32 to vector<8x128xf32>
      %17 = arith.maximumf %15, %16 : vector<8x128xf32>
      %c0_15 = arith.constant 0 : index
      %c0_16 = arith.constant 0 : index
      %18 = vector.load %arg6[%c0_15, %c0_16] : memref<8x128xf32, #tpu.memory_space<vmem>>, vector<8x128xf32>
      tpu.vector_store %arg6[%c0_15, %c0_16], %17 {strides = array<i32>} : memref<8x128xf32, #tpu.memory_space<vmem>>, vector<8x128xf32>,
    } else {
    }
    return
  }
  func.func @transform_0(%arg0: i32, %arg1: i32, %arg2: i32) -> (i32, i32) {
    %c0_i32 = arith.constant 0 : i32
    return %arg0, %arg2 : i32, i32
  }
  func.func @transform_1(%arg0: i32, %arg1: i32, %arg2: i32) -> (i32, i32) {
    %c0_i32 = arith.constant 0 : i32
    return %arg1, %arg2 : i32, i32
  }
  func.func @transform_2(%arg0: i32, %arg1: i32, %arg2: i32) -> (i32, i32) {
    %c0_i32 = arith.constant 0 : i32
    %c0_i32_0 = arith.constant 0 : i32
    return %c0_i32, %arg1 : i32, i32
  }
  func.func @transform_3(%arg0: i32, %arg1: i32, %arg2: i32) -> (i32, i32) {
    %c0_i32 = arith.constant 0 : i32
    return %arg0, %arg1 : i32, i32
  }
}

</mosaic_0001>

<bundles_post_ra>
// kernel: tpu_custom_call.1
= control target key start
LH: loop header
LB: loop body
LE: loop exit
PB: predicated region body
PF: predicated region fallthrough
CT: control target
= control target key end

     0   :  { %8 = vsyncpa [#allocation4], 0  ;;  %s240_s0 = inlined_call_operand.hbm [shape: f32[8,128], index: 0, kind: input, shape index: {}]   ;;  %s241_s1 = inlined_call_operand.hbm [shape: f32[128,128], index: 1, kind: input, shape index: {}]   ;;  %s242_s2 = inlined_call_operand.vmem [shape: f32[1,128], index: 2, kind: input, shape index: {}]   ;;  %s243_s3 = inlined_call_operand.hbm [shape: f32[8,128], index: 3, kind: output, shape index: {}]  }
   0x1   :  { %9 = vsyncpa [#allocation7], 0 }
   0x2   :  { %10 = vsyncpa [#allocation5], 0  ;;  %s16_s14 = sshll.u32 %s240_s0, 4  ;;  %s203_s15 = smov [#allocation3]   ;;  %s17_s14 = int_to_ptr.hbm [resolvable:$true] %s16_s14 }
   0x3   :  { %s18_s16 = sshll.u32 %s203_s15, 4  ;;  %s26_s19 = sshll.u32 %s241_s1, 4  ;;  %s19_s16 = int_to_ptr.vmem [resolvable:$true] %s18_s16  ;;  %s27_s19 = int_to_ptr.hbm [resolvable:$true] %s26_s19 }
   0x4   :  { %21 = dma.hbm_to_vmem [thread:$0]  %s17_s14, 128, %s19_s16, [#allocation4]  }
   0x5   :  { %s204_s20 = smov [#allocation6]   ;;  %s205_s22 = smov 128  }
   0x6   :  { %s28_s21 = sshll.u32 %s204_s20, 4  ;;  %s206_s23 = smov 8   ;;  %s29_s21 = int_to_ptr.vmem [resolvable:$true] %s28_s21 }
   0x7   :  { %34 = dma.hbm_to_vmem [thread:$0]  %s27_s19, 2048, %s29_s21, [#allocation7], %s205_s22, %s205_s22, %s206_s23  }
   0x8   :  { %197 = dma.done.wait [#allocation4], 128  }
   0x9   :  { %198 = vsyncadd [#allocation4], 4294967168 }
   0xa   :  { %199 = dma.done.wait [#allocation7], 2048  }
   0xb   :  { %200 = vsyncadd [#allocation7], 4294965248  ;;  %v66_v0 = vld [vmem:[#allocation6 + $0x78] sm:$0xff]  ;;  %v65_v1 = vld [vmem:[#allocation6 + $0x70] sm:$0xff]  ;;  %s207_s24 = smov [#allocation8]   ;;  %s108_s28 = sshll.u32 %s243_s3, 4  ;;  %s109_s28 = int_to_ptr.hbm [resolvable:$true] %s108_s28 }
   0xc   :  { %68 = vmatpush.xpose.msra.mxu0 %v66_v0  ;;  %v64_v2 = vld [vmem:[#allocation6 + $0x68] sm:$0xff]  ;;  %v63_v3 = vld [vmem:[#allocation6 + $0x60] sm:$0xff]  ;;  %v62_v4 = vld [vmem:[#allocation6 + $0x58] sm:$0xff]  ;;  %s106_s25 = sshll.u32 %s207_s24, 4  ;;  %s107_s25 = int_to_ptr.vmem [resolvable:$true] %s106_s25 }
   0xd   :  { %v61_v5 = vld [vmem:[#allocation6 + $0x50] sm:$0xff]  ;;  %v60_v6 = vld [vmem:[#allocation6 + $0x48] sm:$0xff]  ;;  %v59_v7 = vld [vmem:[#allocation6 + $0x40] sm:$0xff] }
   0xe   :  { %v58_v8 = vld [vmem:[#allocation6 + $0x38] sm:$0xff]  ;;  %v57_v9 = vld [vmem:[#allocation6 + $0x30] sm:$0xff]  ;;  %v56_v10 = vld [vmem:[#allocation6 + $0x28] sm:$0xff] }
   0xf   :  { %v55_v11 = vld [vmem:[#allocation6 + $0x20] sm:$0xff]  ;;  %v54_v12 = vld [vmem:[#allocation6 + $0x18] sm:$0xff]  ;;  %v53_v13 = vld [vmem:[#allocation6 + $0x10] sm:$0xff] }
  0x10   :  { %69 = vmatpush.xpose.msra.mxu0 %v65_v1  ;;  %v52_v14 = vld [vmem:[#allocation6 + $0x8] sm:$0xff]  ;;  %v51_v15 = vld [vmem:[#allocation6] sm:$0xff]  ;;  %v50_v16 = vld [vmem:[#allocation3] sm:$0xff] }
  0x11   :  { %v124_v17 = vld [vmem:[%s242_s2] ss:$0 sm:$0xff] }
  0x14   :  { %70 = vmatpush.xpose.msra.mxu0 %v64_v2 }
  0x18   :  { %71 = vmatpush.xpose.msra.mxu0 %v63_v3 }
  0x1c   :  { %72 = vmatpush.xpose.msra.mxu0 %v62_v4 }
  0x20   :  { %73 = vmatpush.xpose.msra.mxu0 %v61_v5 }
  0x24   :  { %74 = vmatpush.xpose.msra.mxu0 %v60_v6 }
  0x28   :  { %75 = vmatpush.xpose.msra.mxu0 %v59_v7 }
  0x2c   :  { %76 = vmatpush.xpose.msra.mxu0 %v58_v8 }
  0x30   :  { %77 = vmatpush.xpose.msra.mxu0 %v57_v9 }
  0x34   :  { %78 = vmatpush.xpose.msra.mxu0 %v56_v10 }
  0x38   :  { %79 = vmatpush.xpose.msra.mxu0 %v55_v11 }
  0x3c   :  { %80 = vmatpush.xpose.msra.mxu0 %v54_v12 }
  0x40   :  { %81 = vmatpush.xpose.msra.mxu0 %v53_v13 }
  0x44   :  { %82 = vmatpush.xpose.msra.mxu0 %v52_v14 }
  0x48   :  { %83 = vmatpush.xpose.msra.mxu0 %v51_v15 }
  0x4b   :  { %84 = vmatmul.f32.vlgmr.msra.gmra.mxu0 %v50_v16 }
  0xc8   :  { %v85_v18 = vpop.f32.mrf.mxu0 }
  0xc9   :  { %v98_v19 = vadd.f32 %v124_v17, %v85_v18 }
  0xcb   :  { %v99_v20 = vmax.f32 %v98_v19, 0.0 }
  0xcd   :  { %100 = vst [vmem:[#allocation8] sm:$0xff] %v99_v20 }
  0xce   :  { %111 = dma.vmem_to_hbm [thread:$0]  %s107_s25, 128, %s109_s28, [#allocation5]  }
  0xcf   :  { %201 = dma.done.wait [#allocation5], 128  }
  0xd0   :  { %202 = vsyncadd [#allocation5], 4294967168 }
  0xd1   :  { %116 = vsyncpa [#allocation4], 1 }
  0xd2   :  { %117 = vsyncpa [#allocation7], 1 }
  0xd3   :  { %118 = vsyncpa [#allocation5], 1 }

</bundles_post_ra>
